<compile_context>
chip_gen: v7x
topology: tpu7x:2x2x1
jax: 0.10.0
libtpu: 0.0.40
codegen_flags: <defaults>
</compile_context>

<pallas_src>
import functools

import jax
import jax.numpy as jnp
from jax.experimental import pallas as pl
from jax.experimental.pallas import tpu as pltpu

_NEG = -3.0e38
_VMEM_LIMIT = 32 * 1024 * 1024  # well under v7x's 64 MiB physical VMEM


def _ru(x, m):
    return ((x + m - 1) // m) * m


# ----------------------------------------------------------------------------
# Pallas kernels
# ----------------------------------------------------------------------------
def _mm_kernel(act, a_ref, b_ref, s_ref, t_ref, o_ref, acc_ref):
    """Tiled matmul with f32 accumulator + fused affine/activation epilogue."""
    @pl.when(pl.program_id(2) == 0)
    def _():
        acc_ref[...] = jnp.zeros_like(acc_ref)

    acc_ref[...] += jnp.dot(a_ref[...], b_ref[...],
                            preferred_element_type=jnp.float32)

    @pl.when(pl.program_id(2) == pl.num_programs(2) - 1)
    def _():
        y = acc_ref[...] * s_ref[...] + t_ref[...]
        if act == 'relu':
            y = jnp.maximum(y, 0.0)
        elif act == 'sigmoid':
            y = jax.nn.sigmoid(y)
        o_ref[...] = y.astype(o_ref.dtype)


def _prep_mm(w_kn, scale, shift):
    """One-time weight prep: bf16 cast + K/N pre-padding + folded affine."""
    K, N = w_kn.shape
    TK = _ru(K, 128) if K <= 1024 else 512
    TN = 256 if N >= 256 else _ru(N, 128)
    Kp, Np = _ru(K, TK), _ru(N, TN)
    wb = jnp.pad(w_kn.astype(jnp.bfloat16), ((0, Kp - K), (0, Np - N)))
    s = jnp.pad(scale.reshape(1, -1).astype(jnp.float32), ((0, 0), (0, Np - N)))
    t = jnp.pad(shift.reshape(1, -1).astype(jnp.float32), ((0, 0), (0, Np - N)))
    return dict(w=wb, s=s, t=t, K=K, N=N, TK=TK, TN=TN)


def matmul_prepped(a, mm, act='none'):
    """o = act((a @ W) * scale + shift) with a pre-prepped weight bundle."""
    M, K = a.shape
    assert K == mm['K']
    Kp, Np = mm['w'].shape
    TK, TN = mm['TK'], mm['TN']
    TM = 256 if M >= 256 else _ru(M, 8)
    Mp = _ru(M, TM)
    ab = a if a.dtype == jnp.bfloat16 else a.astype(jnp.bfloat16)
    if (Mp, Kp) != (M, K):
        ab = jnp.pad(ab, ((0, Mp - M), (0, Kp - K)))
    out = pl.pallas_call(
        functools.partial(_mm_kernel, act),
        out_shape=jax.ShapeDtypeStruct((Mp, Np), jnp.float32),
        grid=(Mp // TM, Np // TN, Kp // TK),
        in_specs=[
            pl.BlockSpec((TM, TK), lambda i, j, k: (i, k)),
            pl.BlockSpec((TK, TN), lambda i, j, k: (k, j)),
            pl.BlockSpec((1, TN), lambda i, j, k: (0, j)),
            pl.BlockSpec((1, TN), lambda i, j, k: (0, j)),
        ],
        out_specs=pl.BlockSpec((TM, TN), lambda i, j, k: (i, j)),
        scratch_shapes=[pltpu.VMEM((TM, TN), jnp.float32)],
        compiler_params=pltpu.CompilerParams(
            dimension_semantics=("parallel", "parallel", "arbitrary"),
            vmem_limit_bytes=_VMEM_LIMIT),
    )(ab, mm['w'], mm['s'], mm['t'])
    if (Mp, Np) != (M, mm['N']):
        out = out[:M, :mm['N']]
    return out


def _axpy_kernel(act, g_ref, a_ref, b_ref, o_ref):
    y = a_ref[...] * g_ref[0] + b_ref[...]
    if act == 'relu':
        y = jnp.maximum(y, 0.0)
    o_ref[...] = y


def axpy(a, b, g=1.0, act='none'):
    """o = act(g * a + b), elementwise; row-tiled, lane-dense layout."""
    shape = a.shape
    tot = a.size
    width = next((c for c in (512, 256, 128) if tot % c == 0), shape[-1])
    a2 = a.reshape(-1, width)
    b2 = b.reshape(-1, width)
    R, C = a2.shape
    TR = 512 if R >= 512 else _ru(R, 8)
    Rp, Cp = _ru(R, TR), _ru(C, 128)
    if (Rp, Cp) != (R, C):
        a2 = jnp.pad(a2, ((0, Rp - R), (0, Cp - C)))
        b2 = jnp.pad(b2, ((0, Rp - R), (0, Cp - C)))
    gv = jnp.asarray(g, jnp.float32).reshape(1)
    out = pl.pallas_call(
        functools.partial(_axpy_kernel, act),
        out_shape=jax.ShapeDtypeStruct((Rp, Cp), jnp.float32),
        grid=(Rp // TR,),
        in_specs=[
            pl.BlockSpec(memory_space=pltpu.MemorySpace.SMEM),
            pl.BlockSpec((TR, Cp), lambda i: (i, 0)),
            pl.BlockSpec((TR, Cp), lambda i: (i, 0)),
        ],
        out_specs=pl.BlockSpec((TR, Cp), lambda i: (i, 0)),
        compiler_params=pltpu.CompilerParams(
            dimension_semantics=("parallel",), vmem_limit_bytes=_VMEM_LIMIT),
    )(gv, a2, b2)
    if (Rp, Cp) != (R, C):
        out = out[:R, :C]
    return out.reshape(shape)


def _maxpool_kernel(kk, *refs):
    o_ref = refs[kk]
    m = refs[0][...]
    for r in range(1, kk):
        m = jnp.maximum(m, refs[r][...])
    o_ref[...] = m


def maxpool2d(x, k, stride, pad):
    """NHWC max pool; tap reduction happens inside the kernel (no k^2 stack)."""
    N, H, W, C = x.shape
    OH = (H + 2 * pad - k) // stride + 1
    OW = (W + 2 * pad - k) // stride + 1
    xp = x
    if pad:
        xp = jnp.pad(x, ((0, 0), (pad, pad), (pad, pad), (0, 0)),
                     constant_values=_NEG)
    # TODO(synk): shifted-slab slices are still XLA copies; full in-kernel
    # window reads would remove even this traffic.
    slabs = [xp[:, kh:kh + stride * OH:stride, kw:kw + stride * OW:stride, :]
             .reshape(N * OH * OW, C)
             for kh in range(k) for kw in range(k)]
    R = N * OH * OW
    TR = 512 if R >= 512 else _ru(R, 8)
    Rp, Cp = _ru(R, TR), _ru(C, 128)
    if (Rp, Cp) != (R, C):
        slabs = [jnp.pad(s, ((0, Rp - R), (0, Cp - C))) for s in slabs]
    kk = k * k
    out = pl.pallas_call(
        functools.partial(_maxpool_kernel, kk),
        out_shape=jax.ShapeDtypeStruct((Rp, Cp), jnp.float32),
        grid=(Rp // TR,),
        in_specs=[pl.BlockSpec((TR, Cp), lambda i: (i, 0))] * kk,
        out_specs=pl.BlockSpec((TR, Cp), lambda i: (i, 0)),
        compiler_params=pltpu.CompilerParams(
            dimension_semantics=("parallel",), vmem_limit_bytes=_VMEM_LIMIT),
    )(*slabs)
    if (Rp, Cp) != (R, C):
        out = out[:R, :C]
    return out.reshape(N, OH, OW, C)


def _attn_kernel(nhw, q_ref, k_ref, v_ref, o_ref):
    """Fused q@k^T -> masked softmax -> @v for one batch element (VMEM only)."""
    e = jax.lax.dot_general(q_ref[0], k_ref[0], (((1,), (1,)), ((), ())),
                            preferred_element_type=jnp.float32)
    col = jax.lax.broadcasted_iota(jnp.int32, e.shape, 1)
    e = jnp.where(col < nhw, e, -1e30)           # mask padded key columns
    m = jnp.max(e, axis=-1, keepdims=True)
    p = jnp.exp(e - m)
    p = p * pl.reciprocal(jnp.sum(p, axis=-1, keepdims=True), approx=True)
    o_ref[0] = jax.lax.dot_general(p.astype(v_ref.dtype), v_ref[0],
                                   (((1,), (0,)), ((), ())),
                                   preferred_element_type=jnp.float32)


def attention_bmm(q, k, v, nhw, C):
    N, _, c8 = q.shape
    Sp, Dp, Cp = _ru(nhw, 8), _ru(c8, 128), _ru(C, 128)
    qb = jnp.pad(q.astype(jnp.bfloat16), ((0, 0), (0, Sp - nhw), (0, Dp - c8)))
    kb = jnp.pad(k.astype(jnp.bfloat16), ((0, 0), (0, Sp - nhw), (0, Dp - c8)))
    vb = jnp.pad(v.astype(jnp.bfloat16), ((0, 0), (0, Sp - nhw), (0, Cp - C)))
    out = pl.pallas_call(
        functools.partial(_attn_kernel, nhw),
        out_shape=jax.ShapeDtypeStruct((N, Sp, Cp), jnp.float32),
        grid=(N,),
        in_specs=[
            pl.BlockSpec((1, Sp, Dp), lambda b: (b, 0, 0)),
            pl.BlockSpec((1, Sp, Dp), lambda b: (b, 0, 0)),
            pl.BlockSpec((1, Sp, Cp), lambda b: (b, 0, 0)),
        ],
        out_specs=pl.BlockSpec((1, Sp, Cp), lambda b: (b, 0, 0)),
        compiler_params=pltpu.CompilerParams(
            dimension_semantics=("parallel",), vmem_limit_bytes=_VMEM_LIMIT),
    )(qb, kb, vb)
    return out[:, :nhw, :C]


# ----------------------------------------------------------------------------
# Layer helpers (glue: patch extraction / phase decomposition / reshapes)
# ----------------------------------------------------------------------------
def _fold_bn(O, bn=None, bias=None, eps=1e-5):
    if bn is not None:
        s = bn['gamma'] / jnp.sqrt(bn['var'] + eps)
        t = bn['beta'] - bn['mean'] * s
        if bias is not None:
            t = t + s * bias
    else:
        s = jnp.ones((O,), jnp.float32)
        t = bias if bias is not None else jnp.zeros((O,), jnp.float32)
    return s, t


def conv2d_p(x, cp, act='none'):
    """Conv2d with prepped weights; 1x1 convs skip im2col entirely."""
    N, H, W, Cin = x.shape
    KH, KW, stride, pad = cp['KH'], cp['KW'], cp['stride'], cp['pad']
    OH = (H + 2 * pad - KH) // stride + 1
    OW = (W + 2 * pad - KW) // stride + 1
    if KH == 1 and KW == 1 and pad == 0:
        xs = x if stride == 1 else x[:, ::stride, ::stride, :]
        a = xs.reshape(N * OH * OW, Cin)
    else:
        # TODO(synk): im2col is still built by XLA glue (bf16 to halve traffic);
        # fusing the shifted-window reads into the matmul kernel is follow-up.
        xb = x.astype(jnp.bfloat16)
        xp = jnp.pad(xb, ((0, 0), (pad, pad), (pad, pad), (0, 0))) if pad else xb
        cols = [xp[:, kh:kh + stride * OH:stride, kw:kw + stride * OW:stride, :]
                for kh in range(KH) for kw in range(KW)]
        a = jnp.concatenate(cols, axis=-1).reshape(N * OH * OW, KH * KW * Cin)
    out = matmul_prepped(a, cp['mm'], act)
    return out.reshape(N, OH, OW, cp['mm']['N'])


def _phase_geom(L, OL, K, s, p, r):
    """1-D geometry of output-phase r of a transposed conv."""
    o_min = (r - p) % s
    if o_min >= OL:
        return None
    n = (OL - 1 - o_min) // s + 1
    J = len(range(r, K, s))
    q0 = -((r - p) // s)
    start = q0 - (J - 1)
    padL = max(0, -start)
    padR = max(0, start + n + J - 2 - (L - 1))
    return dict(o_min=o_min, n=n, J=J, padL=padL, padR=padR, crop=start + padL)


def conv_transpose2d_p(x, dp, act='none'):
    """ConvTranspose2d via stride^2 phase decomposition (no zero-insertion)."""
    N, H, W, _ = x.shape
    s, p, op = dp['stride'], dp['pad'], dp['out_pad']
    KH, KW = dp['KH'], dp['KW']
    OH = (H - 1) * s - 2 * p + KH + op
    OW = (W - 1) * s - 2 * p + KW + op
    out = jnp.zeros((N, OH, OW, dp['Cout']), jnp.float32)
    xb = x.astype(jnp.bfloat16)
    for rh in range(s):
        gh = _phase_geom(H, OH, KH, s, p, rh)
        if gh is None:
            continue
        for rw in range(s):
            gw = _phase_geom(W, OW, KW, s, p, rw)
            if gw is None:
                continue
            ph = dp['phases'][(rh, rw)]
            if ph is None:  # no contributing taps: output = act(affine(0))
                y = dp['shift']
                if act == 'relu':
                    y = jnp.maximum(y, 0.0)
                elif act == 'sigmoid':
                    y = jax.nn.sigmoid(y)
                y = jnp.broadcast_to(y, (N, gh['n'], gw['n'], dp['Cout']))
            else:
                xs = jnp.pad(xb, ((0, 0), (gh['padL'], gh['padR']),
                                  (gw['padL'], gw['padR']), (0, 0)))
                xs = xs[:, gh['crop']:gh['crop'] + gh['n'] + gh['J'] - 1,
                        gw['crop']:gw['crop'] + gw['n'] + gw['J'] - 1, :]
                y = conv2d_p(xs, ph, act)
            out = out.at[:, gh['o_min']::s, gw['o_min']::s, :].set(y)
    return out


def upsample_bilinear_ac(x, f):
    # nn.UpsamplingBilinear2d (align_corners=True); plain-JAX interpolation glue.
    if f == 1:
        return x
    N, H, W, C = x.shape
    OH, OW = H * f, W * f

    def coords(I, O):
        src = jnp.arange(O, dtype=jnp.float32) * (I - 1) / (O - 1)
        i0 = jnp.floor(src).astype(jnp.int32)
        i1 = jnp.minimum(i0 + 1, I - 1)
        return i0, i1, src - i0.astype(jnp.float32)

    h0, h1, wh = coords(H, OH)
    w0, w1, ww = coords(W, OW)
    xh0, xh1 = x[:, h0, :, :], x[:, h1, :, :]
    ww_ = ww[None, None, :, None]
    top = xh0[:, :, w0, :] * (1 - ww_) + xh0[:, :, w1, :] * ww_
    bot = xh1[:, :, w0, :] * (1 - ww_) + xh1[:, :, w1, :] * ww_
    wh_ = wh[None, :, None, None]
    return top * (1 - wh_) + bot * wh_


# ----------------------------------------------------------------------------
# Model pieces (faithful to the PyTorch forward)
# ----------------------------------------------------------------------------
def basic_block_fwd(x, bp):
    out = conv2d_p(x, bp['conv1'], 'relu')
    out = conv2d_p(out, bp['conv2'], 'none')
    residual = conv2d_p(x, bp['down'], 'none') if 'down' in bp else x
    return axpy(out, residual, 1.0, 'relu')


def encoder_fwd(x, ep):
    return basic_block_fwd(basic_block_fwd(x, ep['b1']), ep['b2'])


def decoder_fwd(x, dp):
    x = conv2d_p(x, dp['conv1'], 'relu')
    x = conv_transpose2d_p(x, dp['tp'], 'relu')
    x = conv2d_p(x, dp['conv2'], 'relu')
    return x


def self_attention(x_ori, ap):
    factor = ap['factor']
    x = maxpool2d(x_ori, factor, factor, 0) if factor > 1 else x_ori
    N, H, W, C = x.shape
    nhw = H * W
    q = conv2d_p(x, ap['q'], 'none').reshape(N, nhw, -1)
    k = conv2d_p(x, ap['k'], 'none').reshape(N, nhw, -1)
    v = conv2d_p(x, ap['v'], 'none').reshape(N, nhw, C)
    out = attention_bmm(q, k, v, nhw, C).reshape(N, H, W, C)
    out = upsample_bilinear_ac(out, factor)
    return axpy(out, x_ori, ap['gamma'], 'relu')


def forward(pp, x_nchw):
    x = jnp.transpose(x_nchw, (0, 2, 3, 1)).astype(jnp.float32)  # NCHW -> NHWC
    x = conv2d_p(x, pp['conv1'], 'relu')
    x = maxpool2d(x, 3, 2, 1)

    e1 = encoder_fwd(x, pp['enc1'])
    e2 = encoder_fwd(e1, pp['enc2'])
    e3 = encoder_fwd(e2, pp['enc3'])
    e4 = encoder_fwd(e3, pp['enc4'])

    # tuner head (flatten in torch NCHW order)
    t0 = jnp.transpose(e4, (0, 3, 1, 2)).reshape(-1, pp['tuner1']['mm']['K'])
    # TODO(synk): nn.Dropout(p=0.5) implemented as identity (inference semantics).
    t1 = matmul_prepped(t0, pp['tuner1']['mm'], 'relu')
    t2 = matmul_prepped(t1, pp['tuner2']['mm'], 'relu')
    p_out = matmul_prepped(t2, pp['tuner3']['mm'], 'none')

    d4 = axpy(decoder_fwd(self_attention(e4, pp['attn4']), pp['dec4']), e3)
    d3 = axpy(decoder_fwd(self_attention(d4, pp['attn3']), pp['dec3']), e2)
    d2 = axpy(decoder_fwd(d3, pp['dec2']), e1)
    d1 = axpy(decoder_fwd(d2, pp['dec1']), x)

    y = conv_transpose2d_p(d1, pp['tpc1'], 'relu')
    y = conv2d_p(y, pp['conv2'], 'relu')
    y = conv_transpose2d_p(y, pp['tpc2'], 'sigmoid')
    return jnp.transpose(y, (0, 3, 1, 2)), p_out  # back to NCHW


# ----------------------------------------------------------------------------
# One-time parameter preparation (BN folding, layout transforms, bf16, padding)
# ----------------------------------------------------------------------------
def prepare_params(p):
    def conv(w, stride, pad, bn=None, bias=None):
        O, Cin, KH, KW = w.shape
        s, t = _fold_bn(O, bn, bias)
        wk = jnp.transpose(w, (2, 3, 1, 0)).reshape(KH * KW * Cin, O)
        return dict(KH=KH, KW=KW, stride=stride, pad=pad, mm=_prep_mm(wk, s, t))

    def deconv(w, stride, pad, out_pad, bn=None, bias=None):
        Cin, Cout, KH, KW = w.shape
        s, t = _fold_bn(Cout, bn, bias)
        phases = {}
        for rh in range(stride):
            th = list(range(rh, KH, stride))
            for rw in range(stride):
                tw = list(range(rw, KW, stride))
                if not th or not tw:
                    phases[(rh, rw)] = None
                    continue
                wsub = w[:, :, th[::-1], :][:, :, :, tw[::-1]]  # (Cin,Cout,Jh,Jw)
                wk = jnp.transpose(wsub, (2, 3, 0, 1)).reshape(
                    len(th) * len(tw) * Cin, Cout)
                phases[(rh, rw)] = dict(KH=len(th), KW=len(tw), stride=1, pad=0,
                                        mm=_prep_mm(wk, s, t))
        return dict(KH=KH, KW=KW, stride=stride, pad=pad, out_pad=out_pad,
                    Cout=Cout, phases=phases, shift=t)

    def bblock(bp, stride):
        d = dict(conv1=conv(bp['conv1_w'], stride, 1, bp['bn1']),
                 conv2=conv(bp['conv2_w'], 1, 1, bp['bn2']))
        if 'down_w' in bp:
            d['down'] = conv(bp['down_w'], stride, 0, bp['down_bn'])
        return d

    def enc(ep, stride):
        return dict(b1=bblock(ep['b1'], stride), b2=bblock(ep['b2'], 1))

    def dec(dp, stride, out_pad):
        return dict(conv1=conv(dp['conv1_w'], 1, 0, dp['bn1']),
                    tp=deconv(dp['tp_w'], stride, 1, out_pad, dp['bn2']),
                    conv2=conv(dp['conv2_w'], 1, 0, dp['bn3']))

    def attn(ap, factor):
        return dict(q=conv(ap['q_w'], 1, 0, None, ap['q_b']),
                    k=conv(ap['k_w'], 1, 0, None, ap['k_b']),
                    v=conv(ap['v_w'], 1, 0, None, ap['v_b']),
                    gamma=ap['gamma'], factor=factor)

    def lin(w, b):
        O = w.shape[0]
        return dict(mm=_prep_mm(jnp.transpose(w), jnp.ones((O,), jnp.float32), b))

    return dict(
        conv1=conv(p['conv1_w'], 2, 3, p['bn1']),
        enc1=enc(p['enc1'], 1), enc2=enc(p['enc2'], 2),
        enc3=enc(p['enc3'], 2), enc4=enc(p['enc4'], 2),
        tuner1=lin(p['tuner1_w'], p['tuner1_b']),
        tuner2=lin(p['tuner2_w'], p['tuner2_b']),
        tuner3=lin(p['tuner3_w'], p['tuner3_b']),
        attn4=attn(p['attn4'], 1), attn3=attn(p['attn3'], 2),
        dec4=dec(p['dec4'], 2, 1), dec3=dec(p['dec3'], 2, 1),
        dec2=dec(p['dec2'], 2, 1), dec1=dec(p['dec1'], 1, 0),
        tpc1=deconv(p['tpc1_w'], 2, 1, 1, p['tpc1_bn'], p['tpc1_b']),
        conv2=conv(p['conv2_w'], 1, 1, p['conv2_bn'], p['conv2_b']),
        tpc2=deconv(p['tpc2_w'], 2, 0, 0, None, p['tpc2_b']),
    )


# ----------------------------------------------------------------------------
# Deterministic parameter init (shapes follow LinkNet3.__init__)
# ----------------------------------------------------------------------------
class _KeyGen:
    def __init__(self, key):
        self.key = key

    def __call__(self):
        self.key, sub = jax.random.split(self.key)
        return sub


def init_params(key, n_channels, n_classes, H, W):
    kg = _KeyGen(key)
    nrm = lambda shape, s=0.05: s * jax.random.normal(kg(), shape, jnp.float32)

    def bn(c):
        return dict(gamma=1.0 + nrm((c,)), beta=nrm((c,)),
                    mean=jnp.zeros((c,), jnp.float32), var=jnp.ones((c,), jnp.float32))

    def bblock(cin, cout, stride):
        d = dict(conv1_w=nrm((cout, cin, 3, 3)), bn1=bn(cout),
                 conv2_w=nrm((cout, cout, 3, 3)), bn2=bn(cout))
        if stride > 1:
            d['down_w'] = nrm((cout, cin, 1, 1))
            d['down_bn'] = bn(cout)
        return d

    def enc(cin, cout, stride):
        return dict(b1=bblock(cin, cout, stride), b2=bblock(cout, cout, 1))

    def dec(cin, cout):
        m = cin // 4
        return dict(conv1_w=nrm((m, cin, 1, 1)), bn1=bn(m),
                    tp_w=nrm((m, m, 3, 3)), bn2=bn(m),
                    conv2_w=nrm((cout, m, 1, 1)), bn3=bn(cout))

    def attn(c):
        return dict(q_w=nrm((c // 8, c, 1, 1)), q_b=nrm((c // 8,)),
                    k_w=nrm((c // 8, c, 1, 1)), k_b=nrm((c // 8,)),
                    v_w=nrm((c, c, 1, 1)), v_b=nrm((c,)),
                    gamma=jnp.asarray([0.5], jnp.float32))  # torch init is 0; nonzero to exercise the path

    p = dict(conv1_w=nrm((64, n_channels, 7, 7)), bn1=bn(64),
             enc1=enc(64, 64, 1), enc2=enc(64, 128, 2),
             enc3=enc(128, 256, 2), enc4=enc(256, 512, 2))

    # module hard-codes 512*17*25 (i.e. a 544x800 input); derived identically here.
    feat = 512 * (H // 32) * (W // 32)
    p.update(tuner1_w=nrm((256, feat)), tuner1_b=nrm((256,)),
             tuner2_w=nrm((128, 256)), tuner2_b=nrm((128,)),
             tuner3_w=nrm((5, 128)), tuner3_b=nrm((5,)))

    p.update(attn4=attn(512), attn3=attn(256),
             dec4=dec(512, 256), dec3=dec(256, 128), dec2=dec(128, 64), dec1=dec(64, 64))

    p.update(tpc1_w=nrm((64, 32, 3, 3)), tpc1_b=nrm((32,)), tpc1_bn=bn(32),
             conv2_w=nrm((32, 32, 3, 3)), conv2_b=nrm((32,)), conv2_bn=bn(32),
             tpc2_w=nrm((32, n_classes, 2, 2)), tpc2_b=nrm((n_classes,)))
    return p


if __name__ == "__main__":
    key = jax.random.PRNGKey(0)
    kx, kp = jax.random.split(key)
    H = W = 64  # must be divisible by 32 (conv1+maxpool+3 strided encoders)
    x = jax.random.normal(kx, (1, 1, H, W), jnp.float32)
    params = init_params(kp, n_channels=1, n_classes=1, H=H, W=W)
    prepped = prepare_params(params)

    y, p_vec = forward(prepped, x)
    jax.block_until_ready((y, p_vec))
    assert y.shape == (1, 1, H, W), y.shape
    assert p_vec.shape == (1, 5), p_vec.shape
    assert bool(jnp.all(jnp.isfinite(y))) and bool(jnp.all(jnp.isfinite(p_vec)))
    print("KERNEL_OK")
</pallas_src>

<mosaic_0001>
module attributes {stable_mosaic.version = 11 : i64} {
  func.func @_mm_kernel(%arg0: i32, %arg1: i32, %arg2: i32, %arg3: memref<256x128xbf16, #tpu.memory_space<vmem>>, %arg4: memref<128x128xbf16, #tpu.memory_space<vmem>>, %arg5: memref<1x128xf32, #tpu.memory_space<vmem>>, %arg6: memref<1x128xf32, #tpu.memory_space<vmem>>, %arg7: memref<256x128xf32, #tpu.memory_space<vmem>>, %arg8: memref<256x128xf32, #tpu.memory_space<vmem>>) attributes {dimension_semantics = [#tpu.dimension_semantics<parallel>, #tpu.dimension_semantics<parallel>, #tpu.dimension_semantics<arbitrary>], iteration_bounds = array<i64: 4, 1, 1>, scalar_prefetch = 0 : i64, scratch_operands = 1 : i64, tpu.core_type = #tpu.core_type<tc>, window_params = [{transform_indices = @transform_0, window_bounds = array<i64: 256, 128>}, {transform_indices = @transform_1, window_bounds = array<i64: 128, 128>}, {transform_indices = @transform_2, window_bounds = array<i64: 1, 128>}, {transform_indices = @transform_3, window_bounds = array<i64: 1, 128>}, {transform_indices = @transform_4, window_bounds = array<i64: 256, 128>}]} {
    %c0_i32 = arith.constant 0 : i32
    %0 = arith.cmpi eq, %arg2, %c0_i32 : i32
    %1 = arith.extui %0 : i1 to i32
    %c0_i32_0 = arith.constant 0 : i32
    %2 = arith.cmpi ne, %1, %c0_i32_0 : i32
    scf.if %2 {
      %cst_10 = arith.constant 0.000000e+00 : f32
      %12 = vector.broadcast %cst_10 : f32 to vector<256x128xf32>
      %c0_11 = arith.constant 0 : index
      %c0_12 = arith.constant 0 : index
      %13 = vector.load %arg8[%c0_11, %c0_12] : memref<256x128xf32, #tpu.memory_space<vmem>>, vector<256x128xf32>
      tpu.vector_store %arg8[%c0_11, %c0_12], %12 {strides = array<i32>} : memref<256x128xf32, #tpu.memory_space<vmem>>, vector<256x128xf32>,
    } else {
    }
    %c0 = arith.constant 0 : index
    %c0_1 = arith.constant 0 : index
    %3 = vector.load %arg8[%c0, %c0_1] : memref<256x128xf32, #tpu.memory_space<vmem>>, vector<256x128xf32>
    %c0_2 = arith.constant 0 : index
    %c0_3 = arith.constant 0 : index
    %4 = vector.load %arg3[%c0_2, %c0_3] : memref<256x128xbf16, #tpu.memory_space<vmem>>, vector<256x128xbf16>
    %c0_4 = arith.constant 0 : index
    %c0_5 = arith.constant 0 : index
    %5 = vector.load %arg4[%c0_4, %c0_5] : memref<128x128xbf16, #tpu.memory_space<vmem>>, vector<128x128xbf16>
    %cst = arith.constant dense<0.000000e+00> : vector<256x128xf32>
    %6 = tpu.matmul %4, %5, %cst {dimension_numbers = #tpu.dot_dimension_numbers<[1], [0], [0], [1], [0, 0, 1, 1], [], []>} : vector<256x128xbf16>, vector<128x128xbf16>, vector<256x128xf32> -> vector<256x128xf32>
    %7 = arith.addf %3, %6 : vector<256x128xf32>
    %c0_6 = arith.constant 0 : index
    %c0_7 = arith.constant 0 : index
    %8 = vector.load %arg8[%c0_6, %c0_7] : memref<256x128xf32, #tpu.memory_space<vmem>>, vector<256x128xf32>
    tpu.vector_store %arg8[%c0_6, %c0_7], %7 {strides = array<i32>} : memref<256x128xf32, #tpu.memory_space<vmem>>, vector<256x128xf32>,
    %c0_i32_8 = arith.constant 0 : i32
    %9 = arith.cmpi eq, %arg2, %c0_i32_8 : i32
    %10 = arith.extui %9 : i1 to i32
    %c0_i32_9 = arith.constant 0 : i32
    %11 = arith.cmpi ne, %10, %c0_i32_9 : i32
    scf.if %11 {
      %c0_10 = arith.constant 0 : index
      %c0_11 = arith.constant 0 : index
      %12 = vector.load %arg8[%c0_10, %c0_11] : memref<256x128xf32, #tpu.memory_space<vmem>>, vector<256x128xf32>
      %c0_12 = arith.constant 0 : index
      %c0_13 = arith.constant 0 : index
      %13 = vector.load %arg5[%c0_12, %c0_13] : memref<1x128xf32, #tpu.memory_space<vmem>>, vector<1x128xf32>
      %14 = vector.broadcast %13 : vector<1x128xf32> to vector<256x128xf32>
      %15 = arith.mulf %12, %14 : vector<256x128xf32>
      %c0_14 = arith.constant 0 : index
      %c0_15 = arith.constant 0 : index
      %16 = vector.load %arg6[%c0_14, %c0_15] : memref<1x128xf32, #tpu.memory_space<vmem>>, vector<1x128xf32>
      %17 = vector.broadcast %16 : vector<1x128xf32> to vector<256x128xf32>
      %18 = arith.addf %15, %17 : vector<256x128xf32>
      %cst_16 = arith.constant 0.000000e+00 : f32
      %19 = vector.broadcast %cst_16 : f32 to vector<256x128xf32>
      %20 = arith.maximumf %18, %19 : vector<256x128xf32>
      %c0_17 = arith.constant 0 : index
      %c0_18 = arith.constant 0 : index
      %21 = vector.load %arg7[%c0_17, %c0_18] : memref<256x128xf32, #tpu.memory_space<vmem>>, vector<256x128xf32>
      tpu.vector_store %arg7[%c0_17, %c0_18], %20 {strides = array<i32>} : memref<256x128xf32, #tpu.memory_space<vmem>>, vector<256x128xf32>,
    } else {
    }
    return
  }
  func.func @transform_0(%arg0: i32, %arg1: i32, %arg2: i32) -> (i32, i32) {
    %c0_i32 = arith.constant 0 : i32
    return %arg0, %arg2 : i32, i32
  }
  func.func @transform_1(%arg0: i32, %arg1: i32, %arg2: i32) -> (i32, i32) {
    %c0_i32 = arith.constant 0 : i32
    return %arg2, %arg1 : i32, i32
  }
  func.func @transform_2(%arg0: i32, %arg1: i32, %arg2: i32) -> (i32, i32) {
    %c0_i32 = arith.constant 0 : i32
    %c0_i32_0 = arith.constant 0 : i32
    return %c0_i32, %arg1 : i32, i32
  }
  func.func @transform_3(%arg0: i32, %arg1: i32, %arg2: i32) -> (i32, i32) {
    %c0_i32 = arith.constant 0 : i32
    %c0_i32_0 = arith.constant 0 : i32
    return %c0_i32, %arg1 : i32, i32
  }
  func.func @transform_4(%arg0: i32, %arg1: i32, %arg2: i32) -> (i32, i32) {
    %c0_i32 = arith.constant 0 : i32
    return %arg0, %arg1 : i32, i32
  }
}

</mosaic_0001>

<bundles_post_ra>
// kernel: tpu_custom_call.1
= control target key start
LH: loop header
LB: loop body
LE: loop exit
PB: predicated region body
PF: predicated region fallthrough
CT: control target
= control target key end

     0   :  { %9 = vsyncpa [#allocation4], 0  ;;  %s1866_s0 = inlined_call_operand.hbm [shape: bf16[1024,128], index: 0, kind: input, shape index: {}]   ;;  %s1867_s1 = inlined_call_operand.hbm [shape: bf16[128,128], index: 1, kind: input, shape index: {}]   ;;  %s1868_s2 = inlined_call_operand.vmem [shape: f32[1,128], index: 2, kind: input, shape index: {}]   ;;  %s1869_s3 = inlined_call_operand.vmem [shape: f32[1,128], index: 3, kind: input, shape index: {}]   ;;  %s1870_s4 = inlined_call_operand.hbm [shape: f32[1024,128], index: 4, kind: output, shape index: {}]  }
   0x1   :  { %11 = vsyncpa [#allocation4 + $0x1], 0 }
   0x2   :  { %12 = vsyncpa [#allocation7], 0 }
   0x3   :  { %13 = vsyncpa [#allocation5], 0 }
   0x4   :  { %15 = vsyncpa [#allocation5 + $0x1], 0  ;;  %s1515_s15 = smov 0   ;;  %s1517_s16 = smov 0  }
   0x5   :  { %s1519_s17 = smov 0   ;;  %s1521_s18 = smov 0  }
   0x6   :  { %s1523_s19 = smov 0   ;;  %s1525_s20 = smov 0  }
   0x7 LB: > { %s1101_s21 = sadd.s32 4294967295, %s1481_s20   ;;  %s1102_s22 = sadd.s32 4294967294, %s1481_s20   ;;  %s1481_s20 = sphi %s1525_s20, %s21_s20   ;;  %s1477_s19 = sphi %s1523_s19, %s1893_s19   ;;  %s1473_s18 = sphi %s1521_s18, %s1892_s18   ;;  %s1469_s17 = sphi %s1519_s17, %s1891_s17   ;;  %s1465_s16 = sphi %s1517_s16, %s1890_s16   ;;  %s1461_s15 = sphi %s1515_s15, %s1889_s15  }
   0x8   : > { %p62_p0 = scmp.ne.s32.totalorder %s1465_s16, %s1461_s15  ;;  %p1549_p1 = scmp.eq.s32.totalorder %s1101_s21, 0 }
   0x9   : > { %p1553_p2 = scmp.eq.s32.totalorder %s1101_s21, 3  ;;  %p174_p3 = scmp.eq.s32.totalorder %s1102_s22, 3 }
   0xa   : > { %s1875_s23 = scalar_select %p1549_p1, 1, 0 }
   0xb   : > { %s1876_s24 = scalar_select %p1553_p2, 1, 0 }
   0xc   : > { %p1559_p4 = por %p1549_p1, %p62_p0  ;;  %p1103_p5 = scmp.ge.s32.totalorder %s1481_s20, 1 }
   0xd   : > { %p1564_p6 = por %p174_p3, %p62_p0  ;;  %p181_p7 = scmp.lt.s32.totalorder %s1481_s20, 5 }
   0xe   : > { %s1877_s25 = scalar_select %p1559_p4, 1, 0 }
   0xf   : > { %s1878_s26 = scalar_select %p1564_p6, 1, 0 }
  0x10   : > { %p1569_p8 = pnand %p1103_p5, %p181_p7  ;;  %s1483_s28 = smov [#allocation6]  }
  0x11   : > { %s197_s29 = sshll.u32 %s1483_s28, 4  ;;  %s40_s5 = sadd.s32 1, %s1477_s19  ;;  %s198_s29 = int_to_ptr.vmem [resolvable:$true] %s197_s29 }
  0x12   : > { %s1879_s27 = scalar_select %p1569_p8, 1, 0 }
  0x13   : > { %p1244_p9 = pneg %p1569_p8  ;;  %s1337_s8 = scalar_lea.hbm %s1867_s1, 1024 }
  0x14   : > { %p1338_p11 = scmp.ne.s32.totalorder %s1867_s1, %s1337_s8  ;;  %p1344_p3 = scmp.lt.u32.totalorder %s1337_s8, %s1867_s1 }
  0x15   : > { %p1577_p10 = pnand %p1244_p9, %p1549_p1 }
  0x17   : > { %p1339_p12 = pneg %p1577_p10 }
  0x19   : > { %p1340_p13 = pnand %p1339_p12, %p1338_p11 }
  0x1b   : > { %p1341_p0 = pneg %p1340_p13 }
  0x1d   : > { %p1346_p5 = pnand %p1344_p3, %p1341_p0 }
  0x1f   : > { %1349 = shalt.err (!%p1346_p5)
}
  0x20   : > { %s1350_s13 = scalar_lea.vmem %s198_s29, 1024  ;;  %p1358_p1 = scmp.lt.s32.totalorder %s198_s29, %s198_s29 }
  0x21   : > { %p1351_p7 = scmp.ne.s32.totalorder %s198_s29, %s1350_s13  ;;  %p1359_p4 = scmp.lt.s32.totalorder %s1350_s13, %s1350_s13 }
  0x23   : > { %p1353_p9 = pnand %p1351_p7, %p1339_p12  ;;  %p1360_p8 = por %p1359_p4, %p1358_p1 }
  0x25   : > { %p1354_p6 = pneg %p1353_p9 }
  0x27   : > { %p1361_p2 = pnand %p1360_p8, %p1354_p6 }
  0x29   : > { %1364 = shalt.err (!%p1361_p2)
}
  0x2a   : > { %s1484_s14 = smov 64   ;;  %s1485_s21 = smov 4  }
  0x2b   : > { %1247 = dma.hbm_to_vmem [thread:$0]  (!%p1577_p10), %s1867_s1, 1024, %s198_s29, [#allocation7], %s1484_s14, %s1484_s14, %s1485_s21  }
  0x2c   : > { %p42_p1 = scmp.ge.s32.totalorder %s40_s5, 4  ;;  %s49_s6 = sadd.s32 1, %s1469_s17 }
  0x2d   : > { %p56_p2 = scmp.ne.s32.totalorder %s1469_s17, %s1465_s16  ;;  %p57_p4 = scmp.eq.s32.totalorder %s1481_s20, 0 }
  0x2e   : > { %s1895_s5 = smov (%p42_p1, %s40_s5), 0  ;;  %p1882_p8 = scmp.ne.s32.totalorder %s1876_s24, 0 }
  0x2f   : > { %p1607_p6 = por %p57_p4, %p56_p2  ;;  %s44_s8 = ssub.s32 %s1477_s19, %s1895_s5 }
  0x30   : > { %p1613_p11 = por %p1882_p8, %p56_p2  ;;  %p1257_p12 = scmp.lt.s32.totalorder %s1481_s20, 4 }
  0x31   : > { %p47_p10 = scmp.eq.s32.totalorder %s44_s8, 0  ;;  %s223_s29 = sand.u32 1, %s1469_s17  }
  0x32   : > { %s1108_s9 = sshll.u32 %s223_s29, 7  ;;  %s1146_s11 = sshll.u32 %s1477_s19, 11 }
  0x33   : > { %s1622_s10 = scalar_select %p47_p10, %s1469_s17, %s49_s6  }
  0x34   : > { %s1628_s22 = scalar_lea.hbm %s1866_s0, %s1146_s11  ;;  %s227_s24 = scalar_lea.vmem [#allocation3], %s1108_s9 }
  0x35   : > { %s235_s28 = sshll.u32 %s227_s24, 4  ;;  %p1634_p13 = pnand %p1257_p12, %p1607_p6  ;;  %s1630_s28 = int_to_ptr.vmem [resolvable:$true] %s235_s28 }
  0x36   : > { %s1638_s6 = scalar_lea.sflag [#allocation4], %s223_s29  ;;  %s1365_s12 = scalar_lea.hbm %s1628_s22, 2048 }
  0x37   : > { %p1366_p0 = scmp.ne.s32.totalorder %s1628_s22, %s1365_s12  ;;  %p1367_p3 = pneg %p1634_p13 }
  0x38   : > { %s1370_s7 = scalar_lea.hbm %s1866_s0, 8192  ;;  %p1371_p9 = scmp.lt.u32.totalorder %s1628_s22, %s1866_s0 }
  0x39   : > { %p1368_p5 = pnand %p1367_p3, %p1366_p0  ;;  %p1372_p1 = scmp.lt.u32.totalorder %s1370_s7, %s1365_s12 }
  0x3a   : > { %p1374_p4 = scmp.lt.u32.totalorder %s1365_s12, %s1628_s22 }
  0x3b   : > { %p1369_p7 = pneg %p1368_p5  ;;  %p1373_p2 = por %p1372_p1, %p1371_p9 }
  0x3d   : > { %p1375_p6 = por %p1374_p4, %p1373_p2 }
  0x3f   : > { %p1376_p8 = pnand %p1375_p6, %p1369_p7 }
  0x41   : > { %1379 = shalt.err (!%p1376_p8)
}
  0x42   : > { %s1380_s29 = scalar_lea.vmem %s1630_s28, 2048  ;;  %s1486_s9 = smov [#allocation3]  }
  0x43   : > { %p1381_p12 = scmp.ne.s32.totalorder %s1630_s28, %s1380_s29  ;;  %s1385_s11 = sshll.u32 %s1486_s9, 4  ;;  %s1386_s11 = int_to_ptr.vmem [resolvable:$false] %s1385_s11 }
  0x44   : > { %s1387_s13 = scalar_lea.vmem %s1386_s11, 4096  ;;  %p1388_p5 = scmp.lt.s32.totalorder %s1630_s28, %s1386_s11 }
  0x45   : > { %p1383_p10 = pnand %p1381_p12, %p1367_p3  ;;  %p1389_p9 = scmp.lt.s32.totalorder %s1387_s13, %s1380_s29 }
  0x47   : > { %p1384_p0 = pneg %p1383_p10  ;;  %p1390_p1 = por %p1389_p9, %p1388_p5 }
  0x49   : > { %p1391_p2 = pnand %p1390_p1, %p1384_p0 }
  0x4b   : > { %1394 = shalt.err (!%p1391_p2)
}
  0x4c   : > { %1251 = dma.hbm_to_vmem [thread:$0]  (!%p1634_p13), %s1628_s22, 2048, %s1630_s28, %s1638_s6, %s1484_s14, %s1484_s14, %s1485_s21  }
  0x4d   : > { %p1885_p3 = scmp.ne.s32.totalorder %s1879_s27, 0 }
  0x4e   : > { %s1672_s12 = sand.u32 (!%p1885_p3), 1, %s1465_s16   ;;  %p1886_p7 = scmp.ne.s32.totalorder (!%p1885_p3), %s1877_s25, 0 }
  0x4f   : > { %247 = sbr.rel (%p1885_p3) target bundleno = 383 (0x17f), region = 36  ;;  %s1112_s7 = sshll.u32 (!%p1885_p3), %s1672_s12, 7 }
  0x50   : > { %s250_s24 = scalar_lea.sflag (!%p1885_p3), [#allocation4], %s1672_s12  ;;  %s1676_s29 = scalar_lea.vmem (!%p1885_p3), [#allocation3], %s1112_s7 }
  0x56   : > { %1448 = dma.done.wait (%p1886_p7), %s250_s24, 2048  }
  0x57   : > { %1450 = vsyncadd (%p1886_p7), %s250_s24, 4294965248  ;;  %p1887_p13 = scmp.ne.s32.totalorder %s1875_s23, 0 }
  0x59   : > { %1452 = dma.done.wait (%p1887_p13), [#allocation7], 1024  }
  0x5a   : > { %1454 = vsyncadd (%p1887_p13), [#allocation7], 4294966272  ;;  %v1313_v0 = vld [vmem:[#allocation6] sm:$0xff]   ;;  %v1314_v1 = vld [vmem:[#allocation6 + $0x8] sm:$0xff]   ;;  %s1114_s21 = sshll.u32 %s1672_s12, 8  ;;  %s1147_s28 = sshll.u32 %s1473_s18, 12 }
  0x5b   : > { %1172 = vmatprep.subr.bf16.mxu0 %v1313_v0  ;;  %1220 = vmatprep.subr.bf16.mxu1 %v1313_v0  ;;  %v1315_v2 = vld [vmem:[#allocation6 + $0x10] sm:$0xff]   ;;  %v1316_v3 = vld [vmem:[#allocation6 + $0x18] sm:$0xff]   ;;  %v1321_v4 = vld [vmem:[%s1676_s29] sm:$0xff]   ;;  %s1729_s22 = scalar_lea.vmem [#allocation8], %s1114_s21  ;;  %s1810_s9 = scalar_lea.hbm %s1870_s4, %s1147_s28 }
  0x5c   : > { %1173 = vmatpush3.bf16.msra.mxu0 %v1313_v0  ;;  %1228 = vmatpush3.bf16.msra.mxu1 %v1313_v0  ;;  %v1322_v5 = vld [vmem:[%s1676_s29 + $0x40] sm:$0xff]   ;;  %v1318_v7 = vld [vmem:[#allocation6 + $0x28] sm:$0xff]   ;;  %v1319_v8 = vld [vmem:[#allocation6 + $0x30] sm:$0xff]   ;;  %s975_s8 = sshll.u32 %s1729_s22, 4  ;;  %s961_s11 = scalar_lea.sflag [#allocation5], %s1672_s12  ;;  %s1812_s8 = int_to_ptr.vmem [resolvable:$true] %s975_s8 }
  0x5d   : > { %1174 = vmatprep.subr.bf16.mxu0 %v1314_v1  ;;  %1221 = vmatprep.subr.bf16.mxu1 %v1314_v1  ;;  %v1317_v6 = vld [vmem:[#allocation6 + $0x20] sm:$0xff]   ;;  %v1320_v9 = vld [vmem:[#allocation6 + $0x38] sm:$0xff]   ;;  %v1323_v10 = vld [vmem:[%s1676_s29 + $0x8] sm:$0xff]   ;;  %s1395_s13 = scalar_lea.vmem %s1812_s8, 4096  ;;  %s1487_s7 = smov [#allocation8]  }
  0x5e   : > { %1188 = vmatprep.mubr.bf16.mxu0 %v1321_v4  ;;  %1204 = vmatprep.mubr.bf16.mxu1 %v1322_v5  ;;  %v1324_v11 = vld [vmem:[%s1676_s29 + $0x48] sm:$0xff]   ;;  %v1325_v12 = vld [vmem:[%s1676_s29 + $0x10] sm:$0xff]   ;;  %v1327_v14 = vld [vmem:[%s1676_s29 + $0x18] sm:$0xff]   ;;  %p1396_p4 = scmp.ne.s32.totalorder %s1812_s8, %s1395_s13  ;;  %s1399_s24 = sshll.u32 %s1487_s7, 4  ;;  %s1400_s24 = int_to_ptr.vmem [resolvable:$false] %s1399_s24 }
  0x5f   : > { %v1326_v13 = vld [vmem:[%s1676_s29 + $0x50] sm:$0xff]   ;;  %v1328_v15 = vld [vmem:[%s1676_s29 + $0x58] sm:$0xff]   ;;  %v1329_v16 = vld [vmem:[%s1676_s29 + $0x20] sm:$0xff]   ;;  %p1402_p12 = scmp.lt.s32.totalorder %s1812_s8, %s1400_s24 }
  0x60   : > { %1175 = vmatpush3.bf16.msra.mxu0 %v1314_v1  ;;  %1229 = vmatpush3.bf16.msra.mxu1 %v1314_v1  ;;  %v1330_v17 = vld [vmem:[%s1676_s29 + $0x60] sm:$0xff]   ;;  %v1331_v18 = vld [vmem:[%s1676_s29 + $0x28] sm:$0xff]   ;;  %v1333_v20 = vld [vmem:[%s1676_s29 + $0x30] sm:$0xff]   ;;  %p1397_p6 = pnand %p1396_p4, %p1613_p11 }
  0x61   : > { %1176 = vmatprep.subr.bf16.mxu0 %v1315_v2  ;;  %1222 = vmatprep.subr.bf16.mxu1 %v1315_v2  ;;  %v1332_v19 = vld [vmem:[%s1676_s29 + $0x68] sm:$0xff]   ;;  %v1334_v21 = vld [vmem:[%s1676_s29 + $0x70] sm:$0xff]   ;;  %v1335_v22 = vld [vmem:[%s1676_s29 + $0x38] sm:$0xff]  }
  0x62   : > { %v1336_v23 = vld [vmem:[%s1676_s29 + $0x78] sm:$0xff]   ;;  %v1705_v24 = vld [vmem:[%s1868_s2] ss:$0 sm:$0xff]  ;;  %p1398_p8 = pneg %p1397_p6  ;;  %s1401_s29 = scalar_lea.vmem %s1400_s24, 8192 }
  0x63   : > { %v1710_v26 = vld [vmem:[%s1869_s3] ss:$0 sm:$0xff]  ;;  %p1403_p10 = scmp.lt.s32.totalorder %s1401_s29, %s1395_s13 }
  0x64   : > { %1177 = vmatpush3.bf16.msra.mxu0 %v1315_v2  ;;  %1230 = vmatpush3.bf16.msra.mxu1 %v1315_v2 }
  0x65   : > { %1178 = vmatprep.subr.bf16.mxu0 %v1316_v3  ;;  %1223 = vmatprep.subr.bf16.mxu1 %v1316_v3  ;;  %p1404_p0 = por %p1403_p10, %p1402_p12 }
  0x67   : > { %p1405_p5 = pnand %p1404_p0, %p1398_p8 }
  0x68   : > { %1179 = vmatpush3.bf16.msra.mxu0 %v1316_v3  ;;  %1231 = vmatpush3.bf16.msra.mxu1 %v1316_v3 }
  0x69   : > { %1180 = vmatprep.subr.bf16.mxu0 %v1317_v6  ;;  %1224 = vmatprep.subr.bf16.mxu1 %v1317_v6 }
  0x6c   : > { %1181 = vmatpush3.bf16.msra.mxu0 %v1317_v6  ;;  %1232 = vmatpush3.bf16.msra.mxu1 %v1317_v6 }
  0x6d   : > { %1182 = vmatprep.subr.bf16.mxu0 %v1318_v7  ;;  %1225 = vmatprep.subr.bf16.mxu1 %v1318_v7 }
  0x70   : > { %1183 = vmatpush3.bf16.msra.mxu0 %v1318_v7  ;;  %1233 = vmatpush3.bf16.msra.mxu1 %v1318_v7 }
  0x71   : > { %1184 = vmatprep.subr.bf16.mxu0 %v1319_v8  ;;  %1226 = vmatprep.subr.bf16.mxu1 %v1319_v8 }
  0x74   : > { %1185 = vmatpush3.bf16.msra.mxu0 %v1319_v8  ;;  %1234 = vmatpush3.bf16.msra.mxu1 %v1319_v8 }
  0x75   : > { %1186 = vmatprep.subr.bf16.mxu0 %v1320_v9  ;;  %1227 = vmatprep.subr.bf16.mxu1 %v1320_v9 }
  0x78   : > { %1187 = vmatpush3.bf16.msra.mxu0 %v1320_v9  ;;  %1235 = vmatpush3.bf16.msra.mxu1 %v1320_v9 }
  0x7b   : > { %1189 = vmatmul.mubr.bf16.vlgmr.msra.gmra.mrb[0].mxu0 %v1323_v10  ;;  %1205 = vmatmul.mubr.bf16.vlgmr.msra.gmra.mrb[0].mxu1 %v1324_v11 }
  0x7c   : > { %1192 = vmatprep.mubr.bf16.mxu0 %v1325_v12  ;;  %1208 = vmatprep.mubr.bf16.mxu1 %v1326_v13 }
  0x83   : > { %1193 = vmatmul.mubr.bf16.gmra.mrb[4].mxu0 %v1327_v14  ;;  %1209 = vmatmul.mubr.bf16.gmra.mrb[4].mxu1 %v1328_v15 }
  0x84   : > { %1196 = vmatprep.mubr.bf16.mxu0 %v1329_v16  ;;  %1212 = vmatprep.mubr.bf16.mxu1 %v1330_v17 }
  0x8b   : > { %1197 = vmatmul.mubr.bf16.gmra.mrb[8].mxu0 %v1331_v18  ;;  %1213 = vmatmul.mubr.bf16.gmra.mrb[8].mxu1 %v1332_v19 }
  0x8c   : > { %1200 = vmatprep.mubr.bf16.mxu0 %v1333_v20  ;;  %1216 = vmatprep.mubr.bf16.mxu1 %v1334_v21 }
  0x93   : > { %1201 = vmatmul.mubr.bf16.gmra.mrb[12].mxu0 %v1335_v22  ;;  %1217 = vmatmul.mubr.bf16.gmra.mrb[12].mxu1 %v1336_v23 }
 0x14e   : > { %v1190_v25 = vpop.f32.mrb[0].mxu0  ;;  %v1206_v27 = vpop.f32.mrb[0].mxu1 }
 0x14f   : > { %v827_v28 = vmul.f32 %v1190_v25, %v1705_v24  ;;  %v843_v29 = vmul.f32 %v1206_v27, %v1705_v24  ;;  %v592_v30 = vpop.f32.mrb[1].mxu0  ;;  %v656_v31 = vpop.f32.mrb[1].mxu1 }
 0x150   : > { %v825_v32 = vmul.f32 %v1705_v24, %v592_v30  ;;  %v841_v33 = vmul.f32 %v1705_v24, %v656_v31  ;;  %v1191_v34 = vpop.f32.mrb[2].mxu0  ;;  %v1207_v35 = vpop.f32.mrb[2].mxu1 }
 0x151   : > { %v866_v36 = vadd.f32 %v1710_v26, %v827_v28  ;;  %v882_v37 = vadd.f32 %v1710_v26, %v843_v29  ;;  %v828_v38 = vmul.f32 %v1191_v34, %v1705_v24  ;;  %v844_v39 = vmul.f32 %v1207_v35, %v1705_v24  ;;  %v595_v40 = vpop.f32.mrb[3].mxu0  ;;  %v659_v41 = vpop.f32.mrb[3].mxu1 }
 0x152   : > { %v864_v42 = vadd.f32 %v1710_v26, %v825_v32  ;;  %v880_v43 = vadd.f32 %v1710_v26, %v841_v33  ;;  %v826_v44 = vmul.f32 %v1705_v24, %v595_v40  ;;  %v842_v45 = vmul.f32 %v1705_v24, %v659_v41 }
 0x153   : > { %v898_v46 = vmax.f32 %v866_v36, 0.0  ;;  %v914_v47 = vmax.f32 %v882_v37, 0.0  ;;  %v867_v48 = vadd.f32 %v1710_v26, %v828_v38  ;;  %v883_v49 = vadd.f32 %v1710_v26, %v844_v39 }
 0x154   : > { %v896_v50 = vmax.f32 %v864_v42, 0.0  ;;  %v912_v51 = vmax.f32 %v880_v43, 0.0  ;;  %v865_v52 = vadd.f32 %v1710_v26, %v826_v44  ;;  %v881_v53 = vadd.f32 %v1710_v26, %v842_v45 }
 0x155   : > { %930 = vst [vmem:[%s1729_s22 + $0x10] sm:$0xff] %v898_v46  ;;  %946 = vst [vmem:[%s1729_s22 + $0x90] sm:$0xff] %v914_v47  ;;  %v899_v54 = vmax.f32 %v867_v48, 0.0  ;;  %v915_v55 = vmax.f32 %v883_v49, 0.0 }
 0x156   : > { %928 = vst [vmem:[%s1729_s22] sm:$0xff] %v896_v50  ;;  %944 = vst [vmem:[%s1729_s22 + $0x80] sm:$0xff] %v912_v51  ;;  %v897_v56 = vmax.f32 %v865_v52, 0.0  ;;  %v913_v57 = vmax.f32 %v881_v53, 0.0  ;;  %v1194_v58 = vpop.f32.mrb[4].mxu0  ;;  %v1210_v59 = vpop.f32.mrb[4].mxu1 }
 0x157   : > { %931 = vst [vmem:[%s1729_s22 + $0x18] sm:$0xff] %v899_v54  ;;  %947 = vst [vmem:[%s1729_s22 + $0x98] sm:$0xff] %v915_v55  ;;  %v831_v60 = vmul.f32 %v1194_v58, %v1705_v24  ;;  %v847_v61 = vmul.f32 %v1210_v59, %v1705_v24  ;;  %v608_v62 = vpop.f32.mrb[5].mxu0  ;;  %v672_v63 = vpop.f32.mrb[5].mxu1 }
 0x158   : > { %929 = vst [vmem:[%s1729_s22 + $0x8] sm:$0xff] %v897_v56  ;;  %945 = vst [vmem:[%s1729_s22 + $0x88] sm:$0xff] %v913_v57  ;;  %v829_v0 = vmul.f32 %v1705_v24, %v608_v62  ;;  %v845_v1 = vmul.f32 %v1705_v24, %v672_v63  ;;  %v1195_v2 = vpop.f32.mrb[6].mxu0  ;;  %v1211_v3 = vpop.f32.mrb[6].mxu1 }
 0x159   : > { %v870_v4 = vadd.f32 %v1710_v26, %v831_v60  ;;  %v886_v5 = vadd.f32 %v1710_v26, %v847_v61  ;;  %v832_v6 = vmul.f32 %v1195_v2, %v1705_v24  ;;  %v848_v7 = vmul.f32 %v1211_v3, %v1705_v24  ;;  %v611_v8 = vpop.f32.mrb[7].mxu0  ;;  %v675_v9 = vpop.f32.mrb[7].mxu1 }
 0x15a   : > { %v868_v10 = vadd.f32 %v1710_v26, %v829_v0  ;;  %v884_v11 = vadd.f32 %v1710_v26, %v845_v1  ;;  %v830_v12 = vmul.f32 %v1705_v24, %v611_v8  ;;  %v846_v13 = vmul.f32 %v1705_v24, %v675_v9 }
 0x15b   : > { %v902_v14 = vmax.f32 %v870_v4, 0.0  ;;  %v918_v15 = vmax.f32 %v886_v5, 0.0  ;;  %v871_v16 = vadd.f32 %v1710_v26, %v832_v6  ;;  %v887_v17 = vadd.f32 %v1710_v26, %v848_v7 }
 0x15c   : > { %v900_v18 = vmax.f32 %v868_v10, 0.0  ;;  %v916_v19 = vmax.f32 %v884_v11, 0.0  ;;  %v869_v20 = vadd.f32 %v1710_v26, %v830_v12  ;;  %v885_v21 = vadd.f32 %v1710_v26, %v846_v13 }
 0x15d   : > { %934 = vst [vmem:[%s1729_s22 + $0x30] sm:$0xff] %v902_v14  ;;  %950 = vst [vmem:[%s1729_s22 + $0xb0] sm:$0xff] %v918_v15  ;;  %v903_v22 = vmax.f32 %v871_v16, 0.0  ;;  %v919_v23 = vmax.f32 %v887_v17, 0.0 }
 0x15e   : > { %932 = vst [vmem:[%s1729_s22 + $0x20] sm:$0xff] %v900_v18  ;;  %948 = vst [vmem:[%s1729_s22 + $0xa0] sm:$0xff] %v916_v19  ;;  %v901_v25 = vmax.f32 %v869_v20, 0.0  ;;  %v917_v27 = vmax.f32 %v885_v21, 0.0  ;;  %v1198_v28 = vpop.f32.mrb[8].mxu0  ;;  %v1214_v29 = vpop.f32.mrb[8].mxu1 }
 0x15f   : > { %935 = vst [vmem:[%s1729_s22 + $0x38] sm:$0xff] %v903_v22  ;;  %951 = vst [vmem:[%s1729_s22 + $0xb8] sm:$0xff] %v919_v23  ;;  %v835_v30 = vmul.f32 %v1198_v28, %v1705_v24  ;;  %v851_v31 = vmul.f32 %v1214_v29, %v1705_v24  ;;  %v624_v32 = vpop.f32.mrb[9].mxu0  ;;  %v688_v33 = vpop.f32.mrb[9].mxu1 }
 0x160   : > { %933 = vst [vmem:[%s1729_s22 + $0x28] sm:$0xff] %v901_v25  ;;  %949 = vst [vmem:[%s1729_s22 + $0xa8] sm:$0xff] %v917_v27  ;;  %v833_v34 = vmul.f32 %v1705_v24, %v624_v32  ;;  %v849_v35 = vmul.f32 %v1705_v24, %v688_v33  ;;  %v1199_v36 = vpop.f32.mrb[10].mxu0  ;;  %v1215_v37 = vpop.f32.mrb[10].mxu1 }
 0x161   : > { %v874_v38 = vadd.f32 %v1710_v26, %v835_v30  ;;  %v890_v39 = vadd.f32 %v1710_v26, %v851_v31  ;;  %v836_v40 = vmul.f32 %v1199_v36, %v1705_v24  ;;  %v852_v41 = vmul.f32 %v1215_v37, %v1705_v24  ;;  %v627_v42 = vpop.f32.mrb[11].mxu0  ;;  %v691_v43 = vpop.f32.mrb[11].mxu1 }
 0x162   : > { %v872_v44 = vadd.f32 %v1710_v26, %v833_v34  ;;  %v888_v45 = vadd.f32 %v1710_v26, %v849_v35  ;;  %v834_v46 = vmul.f32 %v1705_v24, %v627_v42  ;;  %v850_v47 = vmul.f32 %v1705_v24, %v691_v43 }
 0x163   : > { %v906_v48 = vmax.f32 %v874_v38, 0.0  ;;  %v922_v49 = vmax.f32 %v890_v39, 0.0  ;;  %v875_v50 = vadd.f32 %v1710_v26, %v836_v40  ;;  %v891_v51 = vadd.f32 %v1710_v26, %v852_v41 }
 0x164   : > { %v904_v52 = vmax.f32 %v872_v44, 0.0  ;;  %v920_v53 = vmax.f32 %v888_v45, 0.0  ;;  %v873_v54 = vadd.f32 %v1710_v26, %v834_v46  ;;  %v889_v55 = vadd.f32 %v1710_v26, %v850_v47 }
 0x165   : > { %938 = vst [vmem:[%s1729_s22 + $0x50] sm:$0xff] %v906_v48  ;;  %954 = vst [vmem:[%s1729_s22 + $0xd0] sm:$0xff] %v922_v49  ;;  %v907_v56 = vmax.f32 %v875_v50, 0.0  ;;  %v923_v57 = vmax.f32 %v891_v51, 0.0 }
 0x166   : > { %936 = vst [vmem:[%s1729_s22 + $0x40] sm:$0xff] %v904_v52  ;;  %952 = vst [vmem:[%s1729_s22 + $0xc0] sm:$0xff] %v920_v53  ;;  %v905_v58 = vmax.f32 %v873_v54, 0.0  ;;  %v921_v59 = vmax.f32 %v889_v55, 0.0  ;;  %v1202_v60 = vpop.f32.mrb[12].mxu0  ;;  %v1218_v61 = vpop.f32.mrb[12].mxu1 }
 0x167   : > { %939 = vst [vmem:[%s1729_s22 + $0x58] sm:$0xff] %v907_v56  ;;  %955 = vst [vmem:[%s1729_s22 + $0xd8] sm:$0xff] %v923_v57  ;;  %v839_v62 = vmul.f32 %v1202_v60, %v1705_v24  ;;  %v855_v63 = vmul.f32 %v1218_v61, %v1705_v24  ;;  %v640_v0 = vpop.f32.mrb[13].mxu0  ;;  %v704_v1 = vpop.f32.mrb[13].mxu1 }
 0x168   : > { %937 = vst [vmem:[%s1729_s22 + $0x48] sm:$0xff] %v905_v58  ;;  %953 = vst [vmem:[%s1729_s22 + $0xc8] sm:$0xff] %v921_v59  ;;  %v837_v2 = vmul.f32 %v1705_v24, %v640_v0  ;;  %v853_v3 = vmul.f32 %v1705_v24, %v704_v1  ;;  %v1203_v4 = vpop.f32.mrb[14].mxu0  ;;  %v1219_v5 = vpop.f32.mrb[14].mxu1 }
 0x169   : > { %v878_v6 = vadd.f32 %v1710_v26, %v839_v62  ;;  %v894_v7 = vadd.f32 %v1710_v26, %v855_v63  ;;  %v840_v8 = vmul.f32 %v1203_v4, %v1705_v24  ;;  %v856_v9 = vmul.f32 %v1219_v5, %v1705_v24  ;;  %v643_v10 = vpop.f32.mrb[15].mxu0  ;;  %v707_v11 = vpop.f32.mrb[15].mxu1 }
 0x16a   : > { %v876_v12 = vadd.f32 %v1710_v26, %v837_v2  ;;  %v892_v13 = vadd.f32 %v1710_v26, %v853_v3  ;;  %v838_v14 = vmul.f32 %v1705_v24, %v643_v10  ;;  %v854_v15 = vmul.f32 %v1705_v24, %v707_v11 }
 0x16b   : > { %v910_v16 = vmax.f32 %v878_v6, 0.0  ;;  %v926_v17 = vmax.f32 %v894_v7, 0.0  ;;  %v879_v18 = vadd.f32 %v1710_v26, %v840_v8  ;;  %v895_v19 = vadd.f32 %v1710_v26, %v856_v9 }
 0x16c   : > { %v908_v20 = vmax.f32 %v876_v12, 0.0  ;;  %v924_v21 = vmax.f32 %v892_v13, 0.0  ;;  %v877_v22 = vadd.f32 %v1710_v26, %v838_v14  ;;  %v893_v24 = vadd.f32 %v1710_v26, %v854_v15 }
 0x16d   : > { %942 = vst [vmem:[%s1729_s22 + $0x70] sm:$0xff] %v910_v16  ;;  %958 = vst [vmem:[%s1729_s22 + $0xf0] sm:$0xff] %v926_v17  ;;  %v911_v23 = vmax.f32 %v879_v18, 0.0  ;;  %v927_v25 = vmax.f32 %v895_v19, 0.0 }
 0x16e   : > { %940 = vst [vmem:[%s1729_s22 + $0x60] sm:$0xff] %v908_v20  ;;  %956 = vst [vmem:[%s1729_s22 + $0xe0] sm:$0xff] %v924_v21  ;;  %v909_v27 = vmax.f32 %v877_v22, 0.0  ;;  %v925_v28 = vmax.f32 %v893_v24, 0.0 }
 0x16f   : > { %943 = vst [vmem:[%s1729_s22 + $0x78] sm:$0xff] %v911_v23  ;;  %959 = vst [vmem:[%s1729_s22 + $0xf8] sm:$0xff] %v927_v25 }
 0x170   : > { %941 = vst [vmem:[%s1729_s22 + $0x68] sm:$0xff] %v909_v27  ;;  %957 = vst [vmem:[%s1729_s22 + $0xe8] sm:$0xff] %v925_v28 }
 0x171   : > { %1408 = shalt.err (!%p1405_p5)
}
 0x172   : > { %s1409_s23 = scalar_lea.hbm %s1810_s9, 4096  ;;  %s1413_s14 = scalar_lea.hbm %s1870_s4, 16384 }
 0x173   : > { %p1410_p9 = scmp.ne.s32.totalorder %s1810_s9, %s1409_s23  ;;  %p1414_p3 = scmp.lt.u32.totalorder %s1810_s9, %s1870_s4 }
 0x174   : > { %p1415_p7 = scmp.lt.u32.totalorder %s1413_s14, %s1409_s23  ;;  %p1417_p4 = scmp.lt.u32.totalorder %s1409_s23, %s1810_s9 }
 0x175   : > { %p1411_p1 = pnand %p1410_p9, %p1613_p11 }
 0x176   : > { %p1416_p13 = por %p1415_p7, %p1414_p3 }
 0x177   : > { %p1412_p2 = pneg %p1411_p1 }
 0x178   : > { %p1418_p6 = por %p1417_p4, %p1416_p13 }
 0x17a   : > { %p1419_p8 = pnand %p1418_p6, %p1412_p2 }
 0x17c   : > { %1422 = shalt.err (!%p1419_p8)
}
 0x17d   : > { %s1488_s28 = smov 128   ;;  %s1489_s18 = smov 8  }
 0x17e   : > { %1242 = dma.vmem_to_hbm [thread:$0]  (%p1613_p11), %s1812_s8, 4096, %s1810_s9, %s961_s11, %s1488_s28, %s1488_s28, %s1489_s18  }
 0x17f PF: > { %p1259_p12 = scmp.ge.s32.totalorder %s1481_s20, 2  ;;  %s990_s6 = sand.u32 1, %s1461_s15  }
 0x180   : > { %p1888_p10 = scmp.ne.s32.totalorder %s1878_s26, 0  ;;  %s991_s13 = scalar_lea.sflag [#allocation5], %s990_s6 }
 0x182   : > { %p1253_p0 = pnand %p1259_p12, %p1888_p10 }
 0x184   : > { %1456 = dma.done.wait (!%p1253_p0), %s991_s13, 4096  }
 0x185   : > { %1458 = vsyncadd (!%p1253_p0), %s991_s13, 4294963200  ;;  %s21_s20 = sadd.s32 1, %s1481_s20   ;;  %s1889_s15 = smov %s1465_s16 }
 0x186   : > { %p18_p5 = scmp.ge.s32.totalorder %s21_s20, 6   ;;  %s1890_s16 = smov %s1469_s17 }
 0x187   : > { %s1891_s17 = smov %s1622_s10  ;;  %s1892_s18 = smov %s1477_s19 }
 0x188   : > { %s1893_s19 = smov %s1895_s5  ;;  %20 = sbr.rel (!%p18_p5) target bundleno = 7 (0x7), region = 100 }
 0x18f   :  { %996 = vsyncpa [#allocation4], 1 }
 0x190   :  { %998 = vsyncpa [#allocation4 + $0x1], 1 }
 0x191   :  { %999 = vsyncpa [#allocation7], 1 }
 0x192   :  { %1000 = vsyncpa [#allocation5], 1 }
 0x193   :  { %1002 = vsyncpa [#allocation5 + $0x1], 1 }

</bundles_post_ra>
